<compile_context>
chip_gen: v7x
topology: tpu7x:2x2x1
jax: 0.10.0
libtpu: 0.0.40
codegen_flags: <defaults>
</compile_context>

<pallas_src>
import math

import jax
import jax.numpy as jnp
from jax import lax
from jax.experimental import pallas as pl
from jax.experimental.pallas import tpu as pltpu


# ----------------------------------------------------------------------------
# Fused kernel: per-batch  relu(x@W^T+b) projections  +  multi-head attention.
#   Input blocks (batch dim squeezed): q/k/v (S, D);  weights (D, D) resident;
#   biases (1, D) resident.  Output block: (Sq, D) lane-dense.
# ----------------------------------------------------------------------------
def make_fused_mhsa_kernel(num_heads, head_dim, scale):
    def kernel(q_in_ref, k_in_ref, v_in_ref,
               wq_ref, bq_ref, wk_ref, bk_ref, wv_ref, bv_ref,
               o_ref):
        def proj_relu(x_ref, w_ref, b_ref):
            # x: (S, D) @ (D, D) -> (S, D), bias add + ReLU, all in VMEM.
            y = jnp.dot(x_ref[...], w_ref[...],
                        preferred_element_type=jnp.float32)
            return jnp.maximum(y + b_ref[...], 0.0)

        Q = proj_relu(q_in_ref, wq_ref, bq_ref)        # (Sq, H*Dh)
        K = proj_relu(k_in_ref, wk_ref, bk_ref)        # (Sk, H*Dh)
        V = proj_relu(v_in_ref, wv_ref, bv_ref)        # (Sk, H*Dh)

        outs = []
        for h in range(num_heads):                     # static unroll over heads
            lo = h * head_dim
            hi = lo + head_dim
            qh = Q[:, lo:hi] * scale                   # fold 1/sqrt(Dh) into q
            kh = K[:, lo:hi]                           # (Sk, Dh)
            vh = V[:, lo:hi]                           # (Sk, Dh)
            # q @ k^T via contraction on the last axis of both operands;
            # no k.T materialization.
            s = lax.dot_general(qh, kh, (((1,), (1,)), ((), ())),
                                preferred_element_type=jnp.float32)  # (Sq, Sk)
            m = jnp.max(s, axis=-1, keepdims=True)
            e = jnp.exp(s - m)
            denom = jnp.sum(e, axis=-1, keepdims=True)
            p = e * pl.reciprocal(denom, approx=True)  # divide -> EUP slot
            outs.append(jnp.dot(p, vh, preferred_element_type=jnp.float32))
        # Single lane-dense (Sq, H*Dh) store: heads concatenated along lanes,
        # landing directly in the (B, S, d_models) output layout.
        o_ref[...] = jnp.concatenate(outs, axis=-1).astype(o_ref.dtype)
    return kernel


# ----------------------------------------------------------------------------
# Module wrapper: mirrors MultiHeadScalarAttention.forward
# ----------------------------------------------------------------------------
def prepare_params(params):
    """One-time weight prep OUTSIDE the hot path: transpose W, make bias 2-D."""
    prepared = {}
    for name in ("q", "k", "v"):
        prepared[f"w{name}_t"] = jnp.transpose(params[f"w{name}"])  # (D_in, D_out)
        prepared[f"b{name}2"] = params[f"b{name}"].reshape(1, -1)   # (1, D_out)
    return prepared


def multi_head_scalar_attention(query, key, value, prepared,
                                num_heads, head_dim, d_models):
    B, Sq, D = query.shape
    Sk = key.shape[1]
    assert D == d_models == num_heads * head_dim

    scale = 1.0 / math.sqrt(float(head_dim))
    kern = make_fused_mhsa_kernel(num_heads, head_dim, scale)

    act_q_spec = pl.BlockSpec((None, Sq, D), lambda b: (b, 0, 0))
    act_k_spec = pl.BlockSpec((None, Sk, D), lambda b: (b, 0, 0))
    # Constant index_map -> weights/biases stay resident in VMEM across steps.
    w_spec = pl.BlockSpec((D, D), lambda b: (0, 0))
    b_spec = pl.BlockSpec((1, D), lambda b: (0, 0))

    return pl.pallas_call(
        kern,
        out_shape=jax.ShapeDtypeStruct((B, Sq, D), jnp.float32),
        grid_spec=pltpu.PrefetchScalarGridSpec(
            num_scalar_prefetch=0,
            grid=(B,),
            in_specs=[
                act_q_spec, act_k_spec, act_k_spec,
                w_spec, b_spec,            # Wq^T, bq
                w_spec, b_spec,            # Wk^T, bk
                w_spec, b_spec,            # Wv^T, bv
            ],
            out_specs=pl.BlockSpec((None, Sq, D), lambda b: (b, 0, 0)),
        ),
        compiler_params=pltpu.CompilerParams(
            dimension_semantics=("parallel",)),
    )(query, key, value,
      prepared["wq_t"], prepared["bq2"],
      prepared["wk_t"], prepared["bk2"],
      prepared["wv_t"], prepared["bv2"])


# ----------------------------------------------------------------------------
# Pure-JAX reference for validation
# ----------------------------------------------------------------------------
def reference(query, key, value, params, num_heads, head_dim, d_models):
    def lin_relu(x, w, b):
        return jnp.maximum(x @ w.T + b, 0.0)

    B, Sq, D = query.shape
    Sk = key.shape[1]
    Q = lin_relu(query, params["wq"], params["bq"]).reshape(
        B, Sq, num_heads, head_dim).transpose(0, 2, 1, 3)
    K = lin_relu(key, params["wk"], params["bk"]).reshape(
        B, Sk, num_heads, head_dim).transpose(0, 2, 1, 3)
    V = lin_relu(value, params["wv"], params["bv"]).reshape(
        B, Sk, num_heads, head_dim).transpose(0, 2, 1, 3)
    s = jnp.einsum("bhqd,bhkd->bhqk", Q, K) / jnp.sqrt(jnp.float32(head_dim))
    p = jax.nn.softmax(s, axis=-1)
    o = jnp.einsum("bhqk,bhkd->bhqd", p, V)
    return o.transpose(0, 2, 1, 3).reshape(B, Sq, num_heads * head_dim)


if __name__ == "__main__":
    # Small shapes consistent with the module: d_models = num_heads * head_dim
    batch, seq = 2, 8
    num_heads, head_dim = 4, 8
    d_models = num_heads * head_dim       # 32

    key0 = jax.random.PRNGKey(0)
    ks = jax.random.split(key0, 9)
    sc = 0.1
    params = {
        "wq": sc * jax.random.normal(ks[0], (d_models, d_models), jnp.float32),
        "bq": sc * jax.random.normal(ks[1], (d_models,), jnp.float32),
        "wk": sc * jax.random.normal(ks[2], (d_models, d_models), jnp.float32),
        "bk": sc * jax.random.normal(ks[3], (d_models,), jnp.float32),
        "wv": sc * jax.random.normal(ks[4], (d_models, d_models), jnp.float32),
        "bv": sc * jax.random.normal(ks[5], (d_models,), jnp.float32),
    }
    query = jax.random.normal(ks[6], (batch, seq, d_models), jnp.float32)
    key_in = jax.random.normal(ks[7], (batch, seq, d_models), jnp.float32)
    value = jax.random.normal(ks[8], (batch, seq, d_models), jnp.float32)

    prepared = prepare_params(params)     # one-time weight prep (not per call)

    out = multi_head_scalar_attention(query, key_in, value, prepared,
                                      num_heads, head_dim, d_models)
    out = jax.block_until_ready(out)

    ref = reference(query, key_in, value, params, num_heads, head_dim, d_models)
    assert out.shape == (batch, seq, d_models)
    # tolerance accounts for the approx (EUP) reciprocal in the softmax divide
    assert jnp.allclose(out, ref, atol=2e-3, rtol=2e-3), "mismatch vs reference"

    print("KERNEL_OK")
</pallas_src>

<mosaic_0001>
module attributes {stable_mosaic.version = 11 : i64} {
  func.func @kernel(%arg0: i32, %arg1: memref<1x8x32xf32, #tpu.memory_space<vmem>>, %arg2: memref<1x8x32xf32, #tpu.memory_space<vmem>>, %arg3: memref<1x8x32xf32, #tpu.memory_space<vmem>>, %arg4: memref<32x32xf32, #tpu.memory_space<vmem>>, %arg5: memref<1x32xf32, #tpu.memory_space<vmem>>, %arg6: memref<32x32xf32, #tpu.memory_space<vmem>>, %arg7: memref<1x32xf32, #tpu.memory_space<vmem>>, %arg8: memref<32x32xf32, #tpu.memory_space<vmem>>, %arg9: memref<1x32xf32, #tpu.memory_space<vmem>>, %arg10: memref<1x8x32xf32, #tpu.memory_space<vmem>>) attributes {dimension_semantics = [#tpu.dimension_semantics<parallel>], iteration_bounds = array<i64: 2>, scalar_prefetch = 0 : i64, scratch_operands = 0 : i64, tpu.core_type = #tpu.core_type<tc>, window_params = [{transform_indices = @transform_0, window_bounds = array<i64: 1, 8, 32>}, {transform_indices = @transform_1, window_bounds = array<i64: 1, 8, 32>}, {transform_indices = @transform_2, window_bounds = array<i64: 1, 8, 32>}, {pipeline_mode = #tpu.pipeline_mode<synchronous>, transform_indices = @transform_3, window_bounds = array<i64: 32, 32>}, {pipeline_mode = #tpu.pipeline_mode<synchronous>, transform_indices = @transform_4, window_bounds = array<i64: 1, 32>}, {pipeline_mode = #tpu.pipeline_mode<synchronous>, transform_indices = @transform_5, window_bounds = array<i64: 32, 32>}, {pipeline_mode = #tpu.pipeline_mode<synchronous>, transform_indices = @transform_6, window_bounds = array<i64: 1, 32>}, {pipeline_mode = #tpu.pipeline_mode<synchronous>, transform_indices = @transform_7, window_bounds = array<i64: 32, 32>}, {pipeline_mode = #tpu.pipeline_mode<synchronous>, transform_indices = @transform_8, window_bounds = array<i64: 1, 32>}, {transform_indices = @transform_9, window_bounds = array<i64: 1, 8, 32>}]} {
    %c0 = arith.constant 0 : index
    %c0_0 = arith.constant 0 : index
    %c0_1 = arith.constant 0 : index
    %0 = vector.load %arg1[%c0, %c0_0, %c0_1] : memref<1x8x32xf32, #tpu.memory_space<vmem>>, vector<1x8x32xf32>
    %1 = vector.shape_cast %0 : vector<1x8x32xf32> to vector<8x32xf32>
    %c0_2 = arith.constant 0 : index
    %c0_3 = arith.constant 0 : index
    %2 = vector.load %arg4[%c0_2, %c0_3] : memref<32x32xf32, #tpu.memory_space<vmem>>, vector<32x32xf32>
    %cst = arith.constant dense<0.000000e+00> : vector<8x32xf32>
    %3 = tpu.matmul %1, %2, %cst {dimension_numbers = #tpu.dot_dimension_numbers<[1], [0], [0], [1], [0, 0, 1, 1], [], []>} : vector<8x32xf32>, vector<32x32xf32>, vector<8x32xf32> -> vector<8x32xf32>
    %c0_4 = arith.constant 0 : index
    %c0_5 = arith.constant 0 : index
    %4 = vector.load %arg5[%c0_4, %c0_5] : memref<1x32xf32, #tpu.memory_space<vmem>>, vector<1x32xf32>
    %5 = vector.broadcast %4 : vector<1x32xf32> to vector<8x32xf32>
    %6 = arith.addf %3, %5 : vector<8x32xf32>
    %cst_6 = arith.constant 0.000000e+00 : f32
    %7 = vector.broadcast %cst_6 : f32 to vector<8x32xf32>
    %8 = arith.maximumf %6, %7 : vector<8x32xf32>
    %c0_7 = arith.constant 0 : index
    %c0_8 = arith.constant 0 : index
    %c0_9 = arith.constant 0 : index
    %9 = vector.load %arg2[%c0_7, %c0_8, %c0_9] : memref<1x8x32xf32, #tpu.memory_space<vmem>>, vector<1x8x32xf32>
    %10 = vector.shape_cast %9 : vector<1x8x32xf32> to vector<8x32xf32>
    %c0_10 = arith.constant 0 : index
    %c0_11 = arith.constant 0 : index
    %11 = vector.load %arg6[%c0_10, %c0_11] : memref<32x32xf32, #tpu.memory_space<vmem>>, vector<32x32xf32>
    %cst_12 = arith.constant dense<0.000000e+00> : vector<8x32xf32>
    %12 = tpu.matmul %10, %11, %cst_12 {dimension_numbers = #tpu.dot_dimension_numbers<[1], [0], [0], [1], [0, 0, 1, 1], [], []>} : vector<8x32xf32>, vector<32x32xf32>, vector<8x32xf32> -> vector<8x32xf32>
    %c0_13 = arith.constant 0 : index
    %c0_14 = arith.constant 0 : index
    %13 = vector.load %arg7[%c0_13, %c0_14] : memref<1x32xf32, #tpu.memory_space<vmem>>, vector<1x32xf32>
    %14 = vector.broadcast %13 : vector<1x32xf32> to vector<8x32xf32>
    %15 = arith.addf %12, %14 : vector<8x32xf32>
    %cst_15 = arith.constant 0.000000e+00 : f32
    %16 = vector.broadcast %cst_15 : f32 to vector<8x32xf32>
    %17 = arith.maximumf %15, %16 : vector<8x32xf32>
    %c0_16 = arith.constant 0 : index
    %c0_17 = arith.constant 0 : index
    %c0_18 = arith.constant 0 : index
    %18 = vector.load %arg3[%c0_16, %c0_17, %c0_18] : memref<1x8x32xf32, #tpu.memory_space<vmem>>, vector<1x8x32xf32>
    %19 = vector.shape_cast %18 : vector<1x8x32xf32> to vector<8x32xf32>
    %c0_19 = arith.constant 0 : index
    %c0_20 = arith.constant 0 : index
    %20 = vector.load %arg8[%c0_19, %c0_20] : memref<32x32xf32, #tpu.memory_space<vmem>>, vector<32x32xf32>
    %cst_21 = arith.constant dense<0.000000e+00> : vector<8x32xf32>
    %21 = tpu.matmul %19, %20, %cst_21 {dimension_numbers = #tpu.dot_dimension_numbers<[1], [0], [0], [1], [0, 0, 1, 1], [], []>} : vector<8x32xf32>, vector<32x32xf32>, vector<8x32xf32> -> vector<8x32xf32>
    %c0_22 = arith.constant 0 : index
    %c0_23 = arith.constant 0 : index
    %22 = vector.load %arg9[%c0_22, %c0_23] : memref<1x32xf32, #tpu.memory_space<vmem>>, vector<1x32xf32>
    %23 = vector.broadcast %22 : vector<1x32xf32> to vector<8x32xf32>
    %24 = arith.addf %21, %23 : vector<8x32xf32>
    %cst_24 = arith.constant 0.000000e+00 : f32
    %25 = vector.broadcast %cst_24 : f32 to vector<8x32xf32>
    %26 = arith.maximumf %24, %25 : vector<8x32xf32>
    %27 = vector.extract_strided_slice %8 {offsets = [0, 0], sizes = [8, 8], strides = [1, 1]} : vector<8x32xf32> to vector<8x8xf32>
    %cst_25 = arith.constant 0.353553385 : f32
    %28 = vector.broadcast %cst_25 : f32 to vector<8x8xf32>
    %29 = arith.mulf %27, %28 : vector<8x8xf32>
    %30 = vector.extract_strided_slice %17 {offsets = [0, 0], sizes = [8, 8], strides = [1, 1]} : vector<8x32xf32> to vector<8x8xf32>
    %31 = vector.extract_strided_slice %26 {offsets = [0, 0], sizes = [8, 8], strides = [1, 1]} : vector<8x32xf32> to vector<8x8xf32>
    %cst_26 = arith.constant dense<0.000000e+00> : vector<8x8xf32>
    %32 = tpu.matmul %29, %30, %cst_26 {dimension_numbers = #tpu.dot_dimension_numbers<[1], [1], [0], [0], [0, 0, 1, 0], [], []>} : vector<8x8xf32>, vector<8x8xf32>, vector<8x8xf32> -> vector<8x8xf32>
    %cst_27 = arith.constant dense<0xFF800000> : vector<8xf32>
    %33 = vector.multi_reduction <maximumf>, %32, %cst_27 [1] : vector<8x8xf32> to vector<8xf32>
    %34 = vector.shape_cast %33 : vector<8xf32> to vector<8x1xf32>
    %35 = vector.broadcast %34 : vector<8x1xf32> to vector<8x8xf32>
    %36 = arith.subf %32, %35 : vector<8x8xf32>
    %37 = math.exp %36 : vector<8x8xf32>
    %cst_28 = arith.constant dense<0.000000e+00> : vector<8xf32>
    %38 = vector.multi_reduction <add>, %37, %cst_28 [1] : vector<8x8xf32> to vector<8xf32>
    %39 = vector.shape_cast %38 : vector<8xf32> to vector<8x1xf32>
    %40 = tpu.reciprocal %39 {approx = true} : vector<8x1xf32> -> vector<8x1xf32>
    %41 = vector.broadcast %40 : vector<8x1xf32> to vector<8x8xf32>
    %42 = arith.mulf %37, %41 : vector<8x8xf32>
    %cst_29 = arith.constant dense<0.000000e+00> : vector<8x8xf32>
    %43 = tpu.matmul %42, %31, %cst_29 {dimension_numbers = #tpu.dot_dimension_numbers<[1], [0], [0], [1], [0, 0, 1, 1], [], []>} : vector<8x8xf32>, vector<8x8xf32>, vector<8x8xf32> -> vector<8x8xf32>
    %44 = vector.extract_strided_slice %8 {offsets = [0, 8], sizes = [8, 8], strides = [1, 1]} : vector<8x32xf32> to vector<8x8xf32>
    %cst_30 = arith.constant 0.353553385 : f32
    %45 = vector.broadcast %cst_30 : f32 to vector<8x8xf32>
    %46 = arith.mulf %44, %45 : vector<8x8xf32>
    %47 = vector.extract_strided_slice %17 {offsets = [0, 8], sizes = [8, 8], strides = [1, 1]} : vector<8x32xf32> to vector<8x8xf32>
    %48 = vector.extract_strided_slice %26 {offsets = [0, 8], sizes = [8, 8], strides = [1, 1]} : vector<8x32xf32> to vector<8x8xf32>
    %cst_31 = arith.constant dense<0.000000e+00> : vector<8x8xf32>
    %49 = tpu.matmul %46, %47, %cst_31 {dimension_numbers = #tpu.dot_dimension_numbers<[1], [1], [0], [0], [0, 0, 1, 0], [], []>} : vector<8x8xf32>, vector<8x8xf32>, vector<8x8xf32> -> vector<8x8xf32>
    %cst_32 = arith.constant dense<0xFF800000> : vector<8xf32>
    %50 = vector.multi_reduction <maximumf>, %49, %cst_32 [1] : vector<8x8xf32> to vector<8xf32>
    %51 = vector.shape_cast %50 : vector<8xf32> to vector<8x1xf32>
    %52 = vector.broadcast %51 : vector<8x1xf32> to vector<8x8xf32>
    %53 = arith.subf %49, %52 : vector<8x8xf32>
    %54 = math.exp %53 : vector<8x8xf32>
    %cst_33 = arith.constant dense<0.000000e+00> : vector<8xf32>
    %55 = vector.multi_reduction <add>, %54, %cst_33 [1] : vector<8x8xf32> to vector<8xf32>
    %56 = vector.shape_cast %55 : vector<8xf32> to vector<8x1xf32>
    %57 = tpu.reciprocal %56 {approx = true} : vector<8x1xf32> -> vector<8x1xf32>
    %58 = vector.broadcast %57 : vector<8x1xf32> to vector<8x8xf32>
    %59 = arith.mulf %54, %58 : vector<8x8xf32>
    %cst_34 = arith.constant dense<0.000000e+00> : vector<8x8xf32>
    %60 = tpu.matmul %59, %48, %cst_34 {dimension_numbers = #tpu.dot_dimension_numbers<[1], [0], [0], [1], [0, 0, 1, 1], [], []>} : vector<8x8xf32>, vector<8x8xf32>, vector<8x8xf32> -> vector<8x8xf32>
    %61 = vector.extract_strided_slice %8 {offsets = [0, 16], sizes = [8, 8], strides = [1, 1]} : vector<8x32xf32> to vector<8x8xf32>
    %cst_35 = arith.constant 0.353553385 : f32
    %62 = vector.broadcast %cst_35 : f32 to vector<8x8xf32>
    %63 = arith.mulf %61, %62 : vector<8x8xf32>
    %64 = vector.extract_strided_slice %17 {offsets = [0, 16], sizes = [8, 8], strides = [1, 1]} : vector<8x32xf32> to vector<8x8xf32>
    %65 = vector.extract_strided_slice %26 {offsets = [0, 16], sizes = [8, 8], strides = [1, 1]} : vector<8x32xf32> to vector<8x8xf32>
    %cst_36 = arith.constant dense<0.000000e+00> : vector<8x8xf32>
    %66 = tpu.matmul %63, %64, %cst_36 {dimension_numbers = #tpu.dot_dimension_numbers<[1], [1], [0], [0], [0, 0, 1, 0], [], []>} : vector<8x8xf32>, vector<8x8xf32>, vector<8x8xf32> -> vector<8x8xf32>
    %cst_37 = arith.constant dense<0xFF800000> : vector<8xf32>
    %67 = vector.multi_reduction <maximumf>, %66, %cst_37 [1] : vector<8x8xf32> to vector<8xf32>
    %68 = vector.shape_cast %67 : vector<8xf32> to vector<8x1xf32>
    %69 = vector.broadcast %68 : vector<8x1xf32> to vector<8x8xf32>
    %70 = arith.subf %66, %69 : vector<8x8xf32>
    %71 = math.exp %70 : vector<8x8xf32>
    %cst_38 = arith.constant dense<0.000000e+00> : vector<8xf32>
    %72 = vector.multi_reduction <add>, %71, %cst_38 [1] : vector<8x8xf32> to vector<8xf32>
    %73 = vector.shape_cast %72 : vector<8xf32> to vector<8x1xf32>
    %74 = tpu.reciprocal %73 {approx = true} : vector<8x1xf32> -> vector<8x1xf32>
    %75 = vector.broadcast %74 : vector<8x1xf32> to vector<8x8xf32>
    %76 = arith.mulf %71, %75 : vector<8x8xf32>
    %cst_39 = arith.constant dense<0.000000e+00> : vector<8x8xf32>
    %77 = tpu.matmul %76, %65, %cst_39 {dimension_numbers = #tpu.dot_dimension_numbers<[1], [0], [0], [1], [0, 0, 1, 1], [], []>} : vector<8x8xf32>, vector<8x8xf32>, vector<8x8xf32> -> vector<8x8xf32>
    %78 = vector.extract_strided_slice %8 {offsets = [0, 24], sizes = [8, 8], strides = [1, 1]} : vector<8x32xf32> to vector<8x8xf32>
    %cst_40 = arith.constant 0.353553385 : f32
    %79 = vector.broadcast %cst_40 : f32 to vector<8x8xf32>
    %80 = arith.mulf %78, %79 : vector<8x8xf32>
    %81 = vector.extract_strided_slice %17 {offsets = [0, 24], sizes = [8, 8], strides = [1, 1]} : vector<8x32xf32> to vector<8x8xf32>
    %82 = vector.extract_strided_slice %26 {offsets = [0, 24], sizes = [8, 8], strides = [1, 1]} : vector<8x32xf32> to vector<8x8xf32>
    %cst_41 = arith.constant dense<0.000000e+00> : vector<8x8xf32>
    %83 = tpu.matmul %80, %81, %cst_41 {dimension_numbers = #tpu.dot_dimension_numbers<[1], [1], [0], [0], [0, 0, 1, 0], [], []>} : vector<8x8xf32>, vector<8x8xf32>, vector<8x8xf32> -> vector<8x8xf32>
    %cst_42 = arith.constant dense<0xFF800000> : vector<8xf32>
    %84 = vector.multi_reduction <maximumf>, %83, %cst_42 [1] : vector<8x8xf32> to vector<8xf32>
    %85 = vector.shape_cast %84 : vector<8xf32> to vector<8x1xf32>
    %86 = vector.broadcast %85 : vector<8x1xf32> to vector<8x8xf32>
    %87 = arith.subf %83, %86 : vector<8x8xf32>
    %88 = math.exp %87 : vector<8x8xf32>
    %cst_43 = arith.constant dense<0.000000e+00> : vector<8xf32>
    %89 = vector.multi_reduction <add>, %88, %cst_43 [1] : vector<8x8xf32> to vector<8xf32>
    %90 = vector.shape_cast %89 : vector<8xf32> to vector<8x1xf32>
    %91 = tpu.reciprocal %90 {approx = true} : vector<8x1xf32> -> vector<8x1xf32>
    %92 = vector.broadcast %91 : vector<8x1xf32> to vector<8x8xf32>
    %93 = arith.mulf %88, %92 : vector<8x8xf32>
    %cst_44 = arith.constant dense<0.000000e+00> : vector<8x8xf32>
    %94 = tpu.matmul %93, %82, %cst_44 {dimension_numbers = #tpu.dot_dimension_numbers<[1], [0], [0], [1], [0, 0, 1, 1], [], []>} : vector<8x8xf32>, vector<8x8xf32>, vector<8x8xf32> -> vector<8x8xf32>
    %95 = tpu.concatenate %43, %60, %77, %94 in 1 : vector<8x8xf32>, vector<8x8xf32>, vector<8x8xf32>, vector<8x8xf32> -> vector<8x32xf32>
    %c0_45 = arith.constant 0 : index
    %c0_46 = arith.constant 0 : index
    %c0_47 = arith.constant 0 : index
    %96 = vector.load %arg10[%c0_45, %c0_46, %c0_47] : memref<1x8x32xf32, #tpu.memory_space<vmem>>, vector<1x8x32xf32>
    %97 = vector.shape_cast %96 : vector<1x8x32xf32> to vector<8x32xf32>
    %98 = vector.shape_cast %95 : vector<8x32xf32> to vector<1x8x32xf32>
    tpu.vector_store %arg10[%c0_45, %c0_46, %c0_47], %98 {strides = array<i32>} : memref<1x8x32xf32, #tpu.memory_space<vmem>>, vector<1x8x32xf32>,
    return
  }
  func.func @transform_0(%arg0: i32) -> (i32, i32, i32) {
    %c0_i32 = arith.constant 0 : i32
    %c0_i32_0 = arith.constant 0 : i32
    %c0_i32_1 = arith.constant 0 : i32
    return %arg0, %c0_i32, %c0_i32_0 : i32, i32, i32
  }
  func.func @transform_1(%arg0: i32) -> (i32, i32, i32) {
    %c0_i32 = arith.constant 0 : i32
    %c0_i32_0 = arith.constant 0 : i32
    %c0_i32_1 = arith.constant 0 : i32
    return %arg0, %c0_i32, %c0_i32_0 : i32, i32, i32
  }
  func.func @transform_2(%arg0: i32) -> (i32, i32, i32) {
    %c0_i32 = arith.constant 0 : i32
    %c0_i32_0 = arith.constant 0 : i32
    %c0_i32_1 = arith.constant 0 : i32
    return %arg0, %c0_i32, %c0_i32_0 : i32, i32, i32
  }
  func.func @transform_3(%arg0: i32) -> (i32, i32) {
    %c0_i32 = arith.constant 0 : i32
    %c0_i32_0 = arith.constant 0 : i32
    %c0_i32_1 = arith.constant 0 : i32
    return %c0_i32, %c0_i32_0 : i32, i32
  }
  func.func @transform_4(%arg0: i32) -> (i32, i32) {
    %c0_i32 = arith.constant 0 : i32
    %c0_i32_0 = arith.constant 0 : i32
    %c0_i32_1 = arith.constant 0 : i32
    return %c0_i32, %c0_i32_0 : i32, i32
  }
  func.func @transform_5(%arg0: i32) -> (i32, i32) {
    %c0_i32 = arith.constant 0 : i32
    %c0_i32_0 = arith.constant 0 : i32
    %c0_i32_1 = arith.constant 0 : i32
    return %c0_i32, %c0_i32_0 : i32, i32
  }
  func.func @transform_6(%arg0: i32) -> (i32, i32) {
    %c0_i32 = arith.constant 0 : i32
    %c0_i32_0 = arith.constant 0 : i32
    %c0_i32_1 = arith.constant 0 : i32
    return %c0_i32, %c0_i32_0 : i32, i32
  }
  func.func @transform_7(%arg0: i32) -> (i32, i32) {
    %c0_i32 = arith.constant 0 : i32
    %c0_i32_0 = arith.constant 0 : i32
    %c0_i32_1 = arith.constant 0 : i32
    return %c0_i32, %c0_i32_0 : i32, i32
  }
  func.func @transform_8(%arg0: i32) -> (i32, i32) {
    %c0_i32 = arith.constant 0 : i32
    %c0_i32_0 = arith.constant 0 : i32
    %c0_i32_1 = arith.constant 0 : i32
    return %c0_i32, %c0_i32_0 : i32, i32
  }
  func.func @transform_9(%arg0: i32) -> (i32, i32, i32) {
    %c0_i32 = arith.constant 0 : i32
    %c0_i32_0 = arith.constant 0 : i32
    %c0_i32_1 = arith.constant 0 : i32
    return %arg0, %c0_i32, %c0_i32_0 : i32, i32, i32
  }
}

</mosaic_0001>

<bundles_post_ra>
// kernel: tpu_custom_call.1
= control target key start
LH: loop header
LB: loop body
LE: loop exit
PB: predicated region body
PF: predicated region fallthrough
CT: control target
= control target key end

     0   :  { %s2568_s0 = inlined_call_operand.hbm [shape: f32[2,8,32], index: 0, kind: input, shape index: {}]   ;;  %s2569_s1 = inlined_call_operand.hbm [shape: f32[2,8,32], index: 1, kind: input, shape index: {}]   ;;  %s2570_s2 = inlined_call_operand.hbm [shape: f32[2,8,32], index: 2, kind: input, shape index: {}]   ;;  %s2571_s3 = inlined_call_operand.hbm [shape: f32[32,32], index: 3, kind: input, shape index: {}]   ;;  %s2572_s4 = inlined_call_operand.vmem [shape: f32[1,32], index: 4, kind: input, shape index: {}]   ;;  %s2573_s5 = inlined_call_operand.hbm [shape: f32[32,32], index: 5, kind: input, shape index: {}]   ;;  %s2574_s6 = inlined_call_operand.vmem [shape: f32[1,32], index: 6, kind: input, shape index: {}]   ;;  %s2575_s7 = inlined_call_operand.hbm [shape: f32[32,32], index: 7, kind: input, shape index: {}]   ;;  %s2576_s8 = inlined_call_operand.vmem [shape: f32[1,32], index: 8, kind: input, shape index: {}]   ;;  %s2577_s9 = inlined_call_operand.hbm [shape: f32[2,8,32], index: 9, kind: output, shape index: {}]  }
   0x1   :  { %2603 = sst [smem:[#allocation25_spill]] %s2569_s1 }
   0x2   :  { %2604 = sst [smem:[#allocation26_spill]] %s2571_s3 }
   0x3   :  { %2605 = sst [smem:[#allocation27_spill]] %s2576_s8 }
   0x4   :  { %2606 = sst [smem:[#allocation28_spill]] %s2577_s9 }
   0x5   :  { %14 = vsyncpa [#allocation3], 0 }
   0x6   :  { %16 = vsyncpa [#allocation3 + $0x1], 0 }
   0x7   :  { %17 = vsyncpa [#allocation6], 0 }
   0x8   :  { %19 = vsyncpa [#allocation6 + $0x1], 0 }
   0x9   :  { %20 = vsyncpa [#allocation9], 0 }
   0xa   :  { %21 = vsyncpa [#allocation12], 0 }
   0xb   :  { %22 = vsyncpa [#allocation4], 0 }
   0xc   :  { %24 = vsyncpa [#allocation4 + $0x1], 0  ;;  %s2154_s30 = smov 0   ;;  %s2156_s10 = smov 0  }
   0xd   :  { %s2158_s11 = smov 0   ;;  %s2160_s12 = smov 0  }
   0xe LB: > { %2607 = sst [smem:[#allocation19_spill]] %s2072_s30  ;;  %s2175_s13 = sadd.s32 4294967295, %s2084_s12   ;;  %s2084_s12 = sphi %s2160_s12, %s2648_s12   ;;  %s2080_s11 = sphi %s2158_s11, %s2652_s11   ;;  %s2076_s10 = sphi %s2156_s10, %s2651_s10   ;;  %s2072_s30 = sphi %s2154_s30, %s2650_s30  }
   0xf   : > { %2608 = sst [smem:[#allocation20_spill]] %s2084_s12  ;;  %s1554_s14 = sadd.s32 4294967294, %s2084_s12  }
  0x10   : > { %p50_p0 = scmp.ne.s32.totalorder %s2076_s10, %s2072_s30  ;;  %p2578_p1 = scmp.eq.s32.totalorder %s2175_s13, 0 }
  0x11   : > { %p258_p3 = scmp.eq.s32.totalorder %s1554_s14, 1  ;;  %p1555_p5 = scmp.ge.s32.totalorder %s2084_s12, 1 }
  0x12   : > { %p2184_p4 = por %p2578_p1, %p50_p0  ;;  %p265_p7 = scmp.lt.s32.totalorder %s2084_s12, 3 }
  0x13   : > { %p2189_p6 = por %p258_p3, %p50_p0  ;;  %s2086_s18 = smov [#allocation8]  }
  0x14   : > { %s2609_s15 = scalar_select %p2184_p4, 1, 0 }
  0x15   : > { %s2610_s16 = scalar_select %p2189_p6, 1, 0 }
  0x16   : > { %p2194_p8 = pnand %p1555_p5, %p265_p7  ;;  %s277_s19 = sshll.u32 %s2086_s18, 4  ;;  %s2198_s19 = int_to_ptr.vmem [resolvable:$true] %s277_s19 }
  0x17   : > { %2611 = sst [smem:[#allocation21_spill]] %s2610_s16  ;;  %s2210_s21 = sadd.s32 1, %s2084_s12  }
  0x18   : > { %s2612_s17 = scalar_select %p2194_p8, 1, 0 }
  0x19   : > { %p1738_p9 = pneg %p2194_p8  ;;  %2614 = sst [smem:[#allocation22_spill]] %s2210_s21 }
  0x1a   : > { %s37_s22 = sadd.s32 1, %s2080_s11  ;;  %s34_s23 = ssub.s32 %s2084_s12, %s2210_s21 }
  0x1b   : > { %p2205_p11 = pnand %p1738_p9, %p2578_p1  ;;  %s2615_s3 = sld [smem:[#allocation26_spill]] }
  0x1d   : > { %s2613_s20 = scalar_select %p2205_p11, 1, 0 }
  0x1e   : > { %p2223_p13 = pneg %p2205_p11 }
  0x20   : > { %s2616_s29 = scalar_select %p2223_p13, 1, 0 }
  0x21   : > { %s1832_s26 = scalar_lea.hbm %s2615_s3, 512 }
  0x22   : > { %p1833_p12 = scmp.ne.s32.totalorder %s2615_s3, %s1832_s26  ;;  %p1839_p5 = scmp.lt.u32.totalorder %s1832_s26, %s2615_s3 }
  0x24   : > { %p1835_p0 = pnand %p2223_p13, %p1833_p12 }
  0x26   : > { %p1836_p3 = pneg %p1835_p0 }
  0x28   : > { %p1841_p7 = pnand %p1839_p5, %p1836_p3 }
  0x2a   : > { %1844 = shalt.err (!%p1841_p7)
}
  0x2b   : > { %s1845_s24 = scalar_lea.vmem %s2198_s19, 512  ;;  %p1853_p2 = scmp.lt.s32.totalorder %s2198_s19, %s2198_s19 }
  0x2c   : > { %p1846_p9 = scmp.ne.s32.totalorder %s2198_s19, %s1845_s24  ;;  %p1854_p6 = scmp.lt.s32.totalorder %s1845_s24, %s1845_s24 }
  0x2e   : > { %p1848_p10 = pnand %p1846_p9, %p2223_p13  ;;  %p1855_p12 = por %p1854_p6, %p1853_p2 }
  0x30   : > { %p1849_p1 = pneg %p1848_p10 }
  0x32   : > { %p1856_p0 = pnand %p1855_p12, %p1849_p1 }
  0x34   : > { %1859 = shalt.err (!%p1856_p0)
}
  0x35   : > { %s2582_s25 = smov 128   ;;  %s2584_s26 = smov 8  }
  0x36   : > { %1741 = dma.hbm_to_vmem [thread:$0]  (!%p2205_p11), %s2615_s3, 512, %s2198_s19, [#allocation9], %s2582_s25, %s2582_s25, %s2584_s26  }
  0x37   : > { %p35_p1 = scmp.eq.s32.totalorder %s34_s23, 0  ;;  %p44_p2 = scmp.ne.s32.totalorder %s2080_s11, %s2076_s10 }
  0x38   : > { %p45_p6 = scmp.eq.s32.totalorder %s2084_s12, 0  ;;  %p1765_p10 = scmp.lt.s32.totalorder %s2084_s12, 2 }
  0x39   : > { %s2252_s14 = scalar_select %p35_p1, %s2080_s11, %s37_s22  }
  0x3a   : > { %p46_p3 = por %p45_p6, %p44_p2  ;;  %p2618_p5 = scmp.eq.s32.totalorder %s2175_s13, 1 }
  0x3b   : > { %2617 = sst [smem:[#allocation23_spill]] %s2252_s14  ;;  %s2586_s24 = sand.u32 1, %s2080_s11  }
  0x3c   : > { %p2256_p7 = por %p2618_p5, %p44_p2  ;;  %s2262_s21 = sshll.u32 %s2084_s12, 7 }
  0x3d   : > { %s2266_s16 = sshll.u32 %s2586_s24, 3  ;;  %p2268_p9 = pnand %p1765_p10, %p46_p3 }
  0x3e   : > { %s2619_s18 = scalar_select %p2256_p7, 1, 0 }
  0x3f   : > { %s2621_s19 = scalar_select %p2268_p9, 1, 0 }
  0x40   : > { %2620 = sst [smem:[#allocation24_spill]] %s2619_s18  ;;  %s344_s22 = sand.u32 1, %s2084_s12  }
  0x41   : > { %s2622_s1 = sld [smem:[#allocation25_spill]]  ;;  %s348_s25 = scalar_lea.vmem [#allocation5], %s2266_s16 }
  0x42   : > { %s355_s26 = sshll.u32 %s348_s25, 4  ;;  %s2282_s24 = scalar_lea.sflag [#allocation6], %s344_s22  ;;  %s2280_s26 = int_to_ptr.vmem [resolvable:$true] %s355_s26 }
  0x43   : > { %p2288_p0 = pneg %p2268_p9 }
  0x45   : > { %s2623_s14 = scalar_select %p2288_p0, 1, 0 }
  0x47   : > { %s2277_s28 = scalar_lea.hbm %s2622_s1, %s2262_s21  ;;  %s1865_s12 = scalar_lea.hbm %s2622_s1, 256 }
  0x48   : > { %s1860_s3 = scalar_lea.hbm %s2277_s28, 128  ;;  %p1866_p6 = scmp.lt.u32.totalorder %s2277_s28, %s2622_s1 }
  0x49   : > { %p1861_p12 = scmp.ne.s32.totalorder %s2277_s28, %s1860_s3  ;;  %p1867_p10 = scmp.lt.u32.totalorder %s1865_s12, %s1860_s3 }
  0x4a   : > { %p1869_p5 = scmp.lt.u32.totalorder %s1860_s3, %s2277_s28 }
  0x4b   : > { %p1863_p1 = pnand %p2288_p0, %p1861_p12  ;;  %p1868_p3 = por %p1867_p10, %p1866_p6 }
  0x4d   : > { %p1864_p2 = pneg %p1863_p1  ;;  %p1870_p7 = por %p1869_p5, %p1868_p3 }
  0x4f   : > { %p1871_p4 = pnand %p1870_p7, %p1864_p2 }
  0x51   : > { %1874 = shalt.err (!%p1871_p4)
}
  0x52   : > { %s1875_s22 = scalar_lea.vmem %s2280_s26, 128  ;;  %s2089_s23 = smov [#allocation5]  }
  0x53   : > { %p1876_p12 = scmp.ne.s32.totalorder %s2280_s26, %s1875_s22  ;;  %s1880_s27 = sshll.u32 %s2089_s23, 4  ;;  %s1881_s27 = int_to_ptr.vmem [resolvable:$false] %s1880_s27 }
  0x54   : > { %s1882_s30 = scalar_lea.vmem %s1881_s27, 256  ;;  %p1883_p11 = scmp.lt.s32.totalorder %s2280_s26, %s1881_s27 }
  0x55   : > { %p1878_p1 = pnand %p1876_p12, %p2288_p0  ;;  %p1884_p13 = scmp.lt.s32.totalorder %s1882_s30, %s1875_s22 }
  0x57   : > { %p1879_p8 = pneg %p1878_p1  ;;  %p1885_p6 = por %p1884_p13, %p1883_p11 }
  0x59   : > { %p1886_p10 = pnand %p1885_p6, %p1879_p8 }
  0x5b   : > { %1889 = shalt.err (!%p1886_p10)
}
  0x5c   : > { %1754 = dma.hbm_to_vmem [thread:$0]  (!%p2268_p9), %s2277_s28, 128, %s2280_s26, %s2282_s24  }
  0x5d   : > { %s2090_s3 = smov [#allocation10]   ;;  %s2091_s25 = smov [#allocation11]  }
  0x5e   : > { %s293_s12 = sshll.u32 %s2090_s3, 4  ;;  %s309_s1 = sshll.u32 %s2091_s25, 4  ;;  %s294_s12 = int_to_ptr.vmem [resolvable:$true] %s293_s12  ;;  %s310_s1 = int_to_ptr.vmem [resolvable:$true] %s309_s1 }
  0x5f   : > { %s1890_s27 = scalar_lea.hbm %s2573_s5, 512  ;;  %p2624_p8 = scmp.ne.s32.totalorder %s2616_s29, 0 }
  0x60   : > { %p1891_p4 = scmp.ne.s32.totalorder %s2573_s5, %s1890_s27  ;;  %p1897_p7 = scmp.lt.u32.totalorder %s1890_s27, %s2573_s5 }
  0x62   : > { %p1893_p11 = pnand %p1891_p4, %p2624_p8 }
  0x64   : > { %p1894_p13 = pneg %p1893_p11 }
  0x66   : > { %p1899_p2 = pnand %p1897_p7, %p1894_p13 }
  0x68   : > { %1902 = shalt.err (!%p1899_p2)
}
  0x69   : > { %s1903_s26 = scalar_lea.vmem %s294_s12, 512  ;;  %p1911_p1 = scmp.lt.s32.totalorder %s294_s12, %s294_s12 }
  0x6a   : > { %p1904_p3 = scmp.ne.s32.totalorder %s294_s12, %s1903_s26  ;;  %p1912_p6 = scmp.lt.s32.totalorder %s1903_s26, %s1903_s26 }
  0x6c   : > { %p1906_p5 = pnand %p1904_p3, %p2624_p8  ;;  %p1913_p10 = por %p1912_p6, %p1911_p1 }
  0x6e   : > { %p1907_p12 = pneg %p1906_p5 }
  0x70   : > { %p1914_p9 = pnand %p1913_p10, %p1907_p12 }
  0x72   : > { %1917 = shalt.err (!%p1914_p9)
}
  0x73   : > { %p2625_p4 = scmp.ne.s32.totalorder %s2613_s20, 0  ;;  %s2626_s9 = smov 8  }
  0x74   : > { %s2627_s28 = smov 128   ;;  %s1918_s23 = scalar_lea.hbm %s2575_s7, 512 }
  0x75   : > { %1744 = dma.hbm_to_vmem [thread:$0]  (!%p2625_p4), %s2573_s5, 512, %s294_s12, [#allocation9], %s2627_s28, %s2627_s28, %s2626_s9  }
  0x76   : > { %p1919_p11 = scmp.ne.s32.totalorder %s2575_s7, %s1918_s23  ;;  %p1925_p7 = scmp.lt.u32.totalorder %s1918_s23, %s2575_s7 }
  0x78   : > { %p1921_p9 = pnand %p1919_p11, %p2624_p8 }
  0x7a   : > { %p1922_p13 = pneg %p1921_p9 }
  0x7c   : > { %p1927_p2 = pnand %p1925_p7, %p1922_p13 }
  0x7e   : > { %1930 = shalt.err (!%p1927_p2)
}
  0x7f   : > { %s1931_s8 = scalar_lea.vmem %s310_s1, 512  ;;  %p1939_p1 = scmp.lt.s32.totalorder %s310_s1, %s310_s1 }
  0x80   : > { %p1932_p3 = scmp.ne.s32.totalorder %s310_s1, %s1931_s8  ;;  %p1940_p6 = scmp.lt.s32.totalorder %s1931_s8, %s1931_s8 }
  0x82   : > { %p1934_p5 = pnand %p1932_p3, %p2624_p8  ;;  %p1941_p10 = por %p1940_p6, %p1939_p1 }
  0x84   : > { %p1935_p12 = pneg %p1934_p5 }
  0x86   : > { %p1942_p0 = pnand %p1941_p10, %p1935_p12 }
  0x88   : > { %1945 = shalt.err (!%p1942_p0)
}
  0x89   : > { %1747 = dma.hbm_to_vmem [thread:$0]  (!%p2625_p4), %s2575_s7, 512, %s310_s1, [#allocation12], %s2627_s28, %s2627_s28, %s2626_s9  }
  0x8a   : > { %s2358_s25 = scalar_lea.hbm %s2568_s0, %s2262_s21  ;;  %s330_s20 = scalar_lea.vmem [#allocation2], %s2266_s16 }
  0x8b   : > { %s337_s23 = sshll.u32 %s330_s20, 4  ;;  %s2367_s30 = scalar_lea.hbm %s2570_s2, %s2262_s21  ;;  %s2361_s23 = int_to_ptr.vmem [resolvable:$true] %s337_s23 }
  0x8c   : > { %s2628_s26 = sand.u32 1, %s2080_s11   ;;  %s1946_s9 = scalar_lea.hbm %s2358_s25, 128 }
  0x8d   : > { %s327_s1 = scalar_lea.sflag [#allocation3], %s2628_s26  ;;  %p1947_p0 = scmp.ne.s32.totalorder %s2358_s25, %s1946_s9 }
  0x8e   : > { %p2629_p8 = scmp.ne.s32.totalorder %s2623_s14, 0  ;;  %s1951_s12 = scalar_lea.hbm %s2568_s0, 256 }
  0x8f   : > { %p1952_p9 = scmp.lt.u32.totalorder %s2358_s25, %s2568_s0  ;;  %p1953_p13 = scmp.lt.u32.totalorder %s1951_s12, %s1946_s9 }
  0x90   : > { %p1949_p4 = pnand %p1947_p0, %p2629_p8  ;;  %p1955_p2 = scmp.lt.u32.totalorder %s1946_s9, %s2358_s25 }
  0x91   : > { %p1954_p7 = por %p1953_p13, %p1952_p9 }
  0x92   : > { %p1950_p11 = pneg %p1949_p4 }
  0x93   : > { %p1956_p3 = por %p1955_p2, %p1954_p7 }
  0x95   : > { %p1957_p5 = pnand %p1956_p3, %p1950_p11 }
  0x97   : > { %1960 = shalt.err (!%p1957_p5)
}
  0x98   : > { %s1961_s21 = scalar_lea.vmem %s2361_s23, 128  ;;  %s2092_s3 = smov [#allocation2]  }
  0x99   : > { %p1962_p12 = scmp.ne.s32.totalorder %s2361_s23, %s1961_s21  ;;  %s1966_s20 = sshll.u32 %s2092_s3, 4  ;;  %s1967_s20 = int_to_ptr.vmem [resolvable:$false] %s1966_s20 }
  0x9a   : > { %s1968_s27 = scalar_lea.vmem %s1967_s20, 256  ;;  %p1969_p10 = scmp.lt.s32.totalorder %s2361_s23, %s1967_s20 }
  0x9b   : > { %p1964_p1 = pnand %p1962_p12, %p2629_p8  ;;  %p1970_p0 = scmp.lt.s32.totalorder %s1968_s27, %s1961_s21 }
  0x9d   : > { %p1965_p6 = pneg %p1964_p1  ;;  %p1971_p4 = por %p1970_p0, %p1969_p10 }
  0x9f   : > { %p1972_p9 = pnand %p1971_p4, %p1965_p6 }
  0xa1   : > { %1975 = shalt.err (!%p1972_p9)
}
  0xa2   : > { %p2630_p11 = scmp.ne.s32.totalorder %s2621_s19, 0  ;;  %s366_s22 = scalar_lea.vmem [#allocation7], %s2266_s16 }
  0xa3   : > { %s373_s26 = sshll.u32 %s366_s22, 4  ;;  %s1976_s9 = scalar_lea.hbm %s2367_s30, 128  ;;  %s374_s26 = int_to_ptr.vmem [resolvable:$true] %s373_s26 }
  0xa4   : > { %1751 = dma.hbm_to_vmem [thread:$0]  (!%p2630_p11), %s2358_s25, 128, %s2361_s23, %s327_s1  }
  0xa5   : > { %p1977_p13 = scmp.ne.s32.totalorder %s2367_s30, %s1976_s9  ;;  %s1981_s12 = scalar_lea.hbm %s2570_s2, 256 }
  0xa6   : > { %p1982_p3 = scmp.lt.u32.totalorder %s2367_s30, %s2570_s2  ;;  %p1983_p5 = scmp.lt.u32.totalorder %s1981_s12, %s1976_s9 }
  0xa7   : > { %p1979_p7 = pnand %p1977_p13, %p2629_p8  ;;  %p1985_p1 = scmp.lt.u32.totalorder %s1976_s9, %s2367_s30 }
  0xa8   : > { %p1984_p12 = por %p1983_p5, %p1982_p3 }
  0xa9   : > { %p1980_p2 = pneg %p1979_p7 }
  0xaa   : > { %p1986_p6 = por %p1985_p1, %p1984_p12 }
  0xac   : > { %p1987_p10 = pnand %p1986_p6, %p1980_p2 }
  0xae   : > { %1990 = shalt.err (!%p1987_p10)
}
  0xaf   : > { %s1991_s16 = scalar_lea.vmem %s374_s26, 128  ;;  %s2093_s25 = smov [#allocation7]  }
  0xb0   : > { %p1992_p0 = scmp.ne.s32.totalorder %s374_s26, %s1991_s16  ;;  %s1996_s23 = sshll.u32 %s2093_s25, 4  ;;  %s1997_s23 = int_to_ptr.vmem [resolvable:$false] %s1996_s23 }
  0xb1   : > { %s1998_s1 = scalar_lea.vmem %s1997_s23, 256  ;;  %p1999_p13 = scmp.lt.s32.totalorder %s374_s26, %s1997_s23 }
  0xb2   : > { %p1994_p4 = pnand %p1992_p0, %p2629_p8  ;;  %p2000_p7 = scmp.lt.s32.totalorder %s1998_s1, %s1991_s16 }
  0xb4   : > { %p1995_p9 = pneg %p1994_p4  ;;  %p2001_p11 = por %p2000_p7, %p1999_p13 }
  0xb6   : > { %p2002_p3 = pnand %p2001_p11, %p1995_p9 }
  0xb8   : > { %2005 = shalt.err (!%p2002_p3)
}
  0xb9   : > { %p2631_p5 = scmp.ne.s32.totalorder %s2621_s19, 0  ;;  %p2632_p2 = scmp.ne.s32.totalorder %s2612_s17, 0 }
  0xba   : > { %s2414_s14 = sand.u32 (!%p2632_p2), 1, %s2076_s10   ;;  %p2633_p8 = scmp.ne.s32.totalorder (!%p2632_p2), %s2609_s15, 0 }
  0xbb   : > { %1757 = dma.hbm_to_vmem [thread:$0]  (!%p2631_p5), %s2367_s30, 128, %s374_s26, %s2282_s24  }
  0xbc   : > { %382 = sbr.rel (%p2632_p2) target bundleno = 1427 (0x593), region = 56  ;;  %s2417_s21 = sshll.u32 (!%p2632_p2), %s2414_s14, 3 }
  0xbd   : > { %s385_s3 = scalar_lea.sflag (!%p2632_p2), [#allocation3], %s2414_s14  ;;  %s388_s20 = scalar_lea.vmem (!%p2632_p2), [#allocation2], %s2417_s21 }
  0xc3   : > { %2051 = dma.done.wait (%p2633_p8), %s385_s3, 128  }
  0xc4   : > { %2053 = vsyncadd (%p2633_p8), %s385_s3, 4294967168  ;;  %s393_s17 = sand.u32 1, %s2175_s13   ;;  %s397_s19 = scalar_lea.vmem [#allocation5], %s2417_s21 }
  0xc5   : > { %s394_s24 = scalar_lea.sflag [#allocation6], %s393_s17 }
  0xc6   : > { %2055 = dma.done.wait (%p2633_p8), %s394_s24, 256  }
  0xc7   : > { %2057 = vsyncadd (%p2633_p8), %s394_s24, 4294967040  ;;  %s406_s30 = scalar_lea.vmem [#allocation7], %s2417_s21  ;;  %p2634_p11 = scmp.eq.s32.totalorder %s2175_s13, 0 }
  0xc9   : > { %2059 = dma.done.wait (%p2634_p11), [#allocation9], 1024   ;;  %p2635_p12 = pmov %p2634_p11 }
  0xca   : > { %p2636_p1 = pmov %p2634_p11 }
  0xcb   : > { %2061 = vsyncadd (%p2635_p12), [#allocation9], 4294966272 }
  0xcc   : > { %2063 = dma.done.wait (%p2636_p1), [#allocation12], 512   ;;  %p2637_p6 = pmov %p2636_p1 }
  0xcd   : > { %v2094_v0 = vmov 0.0|0.0   ;;  %vm2095_vm0 = vmmov 0   ;;  %v2096_v1 = vmov 0.0   ;;  %v551_v2 = vld [vmem:[#allocation10] sm:$0xff]  ;;  %v552_v3 = vld [vmem:[#allocation10 + $0x8] sm:$0xff]  ;;  %v553_v7 = vld [vmem:[#allocation10 + $0x10] sm:$0xff] }
  0xce   : > { %2065 = vsyncadd (%p2637_p6), [#allocation12], 4294966784  ;;  %1706 = vmatprep.subr.bf16.mxu1 %v2094_v0  ;;  %1700 = vmatprep.subr.bf16.mxu0 %v2094_v0  ;;  %v464_v4 = vld [vmem:[#allocation8] sm:$0xff]  ;;  %v1707_v5 = vpack.c.bf16 %v552_v3, %v551_v2  ;;  %v465_v6 = vld [vmem:[#allocation8 + $0x8] sm:$0xff]  ;;  %vm475_vm1 = vcmask 261120   ;;  %vm723_vm2 = vcmask 64512  }
  0xcf   : > { %1646 = vmatprep.mubr.msk.f32.mxu1 %vm2095_vm0, %v2096_v1  ;;  %1635 = vmatprep.mubr.msk.f32.mxu0 %vm2095_vm0, %v2096_v1  ;;  %v554_v8 = vld [vmem:[#allocation10 + $0x18] sm:$0xff]  ;;  %v1701_v9 = vpack.c.bf16 %v465_v6, %v464_v4  ;;  %v466_v10 = vld [vmem:[#allocation8 + $0x10] sm:$0xff]  ;;  %v550_v14 = vld [vmem:[%s397_s19] sm:$0xff]  ;;  %s2097_s9 = smov 112   ;;  %s2098_s28 = smov 120   ;;  %vm1393_vm3 = vcmask 130048  }
  0xd0   : > { %v467_v11 = vld [vmem:[#allocation8 + $0x18] sm:$0xff]  ;;  %1708 = vmatpush3.bf16.msra.mxu1 %v1707_v5  ;;  %v1710_v12 = vpack.c.bf16 %v554_v8, %v553_v7  ;;  %v637_v16 = vld [vmem:[#allocation11] sm:$0xff]  ;;  %v638_v17 = vld [vmem:[#allocation11 + $0x8] sm:$0xff]  ;;  %s2099_s8 = smov 104   ;;  %s2638_s29 = sld [smem:[#allocation27_spill]]  ;;  %vm1395_vm4 = vcmask 195584  }
  0xd1   : > { %1702 = vmatpush3.bf16.msra.mxu0 %v1701_v9  ;;  %1709 = vmatprep.subr.bf16.mxu1 %v2094_v0  ;;  %v1704_v13 = vpack.c.bf16 %v467_v11, %v466_v10  ;;  %v463_v15 = vld [vmem:[%s388_s20] sm:$0xff]  ;;  %v1713_v19 = vpack.c.bf16 %v638_v17, %v637_v16  ;;  %s2100_s16 = smov 8   ;;  %s2101_s25 = smov 16  }
  0xd2   : > { %1703 = vmatprep.subr.bf16.mxu0 %v2094_v0  ;;  %v639_v18 = vld [vmem:[#allocation11 + $0x10] sm:$0xff]  ;;  %v640_v20 = vld [vmem:[#allocation11 + $0x18] sm:$0xff]  ;;  %s2102_s23 = smov 24   ;;  %s2639_s1 = sld [smem:[#allocation24_spill]] }
  0xd3   : > { %v1716_v21 = vpack.c.bf16 %v640_v20, %v639_v18  ;;  %v636_v22 = vld [vmem:[%s406_s30] sm:$0xff]  ;;  %s1593_s3 = sshll.u32 %s2175_s13, 7  ;;  %s462_s20 = scalar_lea.vmem [#allocation13], %s2417_s21 }
  0xd4   : > { %1711 = vmatpush3.bf16.msra.mxu1 %v1710_v12  ;;  %v1576_v23 = vld [vmem:[%s2574_s6] ss:$0 sm:$0xff]  ;;  %s1412_s17 = sshll.u32 %s462_s20, 4  ;;  %s2640_s30 = sld [smem:[#allocation28_spill]]  ;;  %s2525_s17 = int_to_ptr.vmem [resolvable:$true] %s1412_s17 }
  0xd5   : > { %1705 = vmatpush3.bf16.msra.mxu0 %v1704_v13  ;;  %1660 = vmatprep.subr.mxu1 %v2096_v1  ;;  %v1574_v24 = vld [vmem:[%s2572_s4] ss:$0 sm:$0xff]  ;;  %s1399_s13 = scalar_lea.sflag [#allocation4], %s2414_s14  ;;  %s2006_s21 = scalar_lea.vmem %s2525_s17, 128 }
  0xd6   : > { %1712 = vmatprep.subr.bf16.mxu0 %v2094_v0  ;;  %v1578_v40 = vld [vmem:[%s2638_s29] ss:$0 sm:$0xff]  ;;  %p2007_p10 = scmp.ne.s32.totalorder %s2525_s17, %s2006_s21  ;;  %s2103_s22 = smov [#allocation13]  }
  0xd7   : > { %1647 = vmatmul.mubr.msk.f32.vlgmr.msra.gmra.mrb[0].mxu1 %vm475_vm1, %v550_v14  ;;  %s2010_s26 = sshll.u32 %s2103_s22, 4  ;;  %s2011_s26 = int_to_ptr.vmem [resolvable:$false] %s2010_s26 }
  0xd8   : > { %1636 = vmatmul.mubr.msk.f32.vlgmr.msra.gmra.mrb[0].mxu0 %vm475_vm1, %v463_v15  ;;  %1662 = vmatprep.mubr.msk.f32.mxu1 %vm2095_vm0, %v2096_v1  ;;  %p2642_p0 = scmp.ne.s32.totalorder %s2639_s1, 0  ;;  %p2013_p13 = scmp.lt.s32.totalorder %s2525_s17, %s2011_s26 }
  0xd9   : > { %1657 = vmatprep.mubr.msk.f32.mxu0 %vm2095_vm0, %v2096_v1  ;;  %1714 = vmatpush3.bf16.msra.mxu0 %v1713_v19 }
  0xda   : > { %1715 = vmatprep.subr.bf16.mxu0 %v2094_v0  ;;  %s2641_s15 = smov %s2640_s30  ;;  %s2523_s27 = scalar_lea.hbm %s2640_s30, %s1593_s3 }
  0xdb   : > { %p2008_p4 = pnand %p2007_p10, %p2642_p0 }
  0xdd   : > { %1717 = vmatpush3.bf16.msra.mxu0 %v1716_v21  ;;  %p2009_p9 = pneg %p2008_p4 }
  0xde   : > { %1670 = vmatprep.subr.mxu0 %v2096_v1 }
  0xe0   : > { %1658 = vmatmul.mubr.msk.f32.vlgmr.msra.gmra.mrb[2].mxu0 %vm475_vm1, %v636_v22 }
  0xe1   : > { %1672 = vmatprep.mubr.msk.f32.mxu0 %vm2095_vm0, %v2096_v1 }
 0x1aa   : > { %v631_v25 = vpop.f32.mrb[0].mxu1 }
 0x1ab   : > { %v632_v26 = vadd.f32 %v1576_v23, %v631_v25  ;;  %v545_v27 = vpop.f32.mrb[0].mxu0  ;;  %v1648_v28 = vpop.f32.mrb[1].mxu1 }
 0x1ac   : > { %v546_v29 = vadd.f32 %v1574_v24, %v545_v27  ;;  %v1637_v30 = vpop.f32.mrb[1].mxu0 }
 0x1ad   : > { %v635_v31 = vmax.f32 %v632_v26, 0.0 }
 0x1ae   : > { %v549_v32 = vmax.f32 %v546_v29, 0.0 }
 0x1af   : > { %1052 = vrot.lane.b32.xlu1 %v635_v31, %s2097_s9  ;;  %886 = vrot.lane.b32.xlu0 %v635_v31, %s2098_s28 }
 0x1b0   : > { %v722_v33 = vmul.f32 0.35355338, %v549_v32  ;;  %1661 = vmatpush3.xpose.msk.msra.mxu1 %vm723_vm2, %v635_v31 }
 0x1b1   : > { %1665 = vmatprep.subr.mxu1 %v2096_v1 }
 0x1b3   : > { %1663 = vmatmul.mubr.msk.f32.vlgmr.msra.gmra.mrb[2].mxu1 %vm723_vm2, %v722_v33  ;;  %1050 = vrot.lane.b32.xlu1 %v722_v33, %s2097_s9  ;;  %v717_v41 = vpop.f32.mrb[2].mxu0 }
 0x1b4   : > { %884 = vrot.lane.b32.xlu0 %v722_v33, %s2098_s28  ;;  %1667 = vmatprep.mubr.msk.f32.mxu1 %vm2095_vm0, %v2096_v1  ;;  %v718_v42 = vadd.f32 %v1578_v40, %v717_v41  ;;  %v1659_v43 = vpop.f32.mrb[3].mxu0 }
 0x1b6   : > { %v721_v44 = vmax.f32 %v718_v42, 0.0 }
 0x1b7   : > { %1215 = vrot.lane.b32.xlu1 %v722_v33, %s2099_s8 }
 0x1b8   : > { %1217 = vrot.lane.b32.xlu0 %v635_v31, %s2099_s8  ;;  %1666 = vmatpush3.msra.mxu1 %v721_v44 }
 0x1b9   : > { %1675 = vmatprep.subr.mxu1 %v2096_v1 }
 0x221   : > { %v887_v34 = vpop.permute.xlu0 %886  ;;  %v1053_v35 = vpop.permute.xlu1 %1052 }
 0x222   : > { %1671 = vmatpush3.xpose.msk.msra.mxu0 %vm723_vm2, %v887_v34 }
 0x223   : > { %1680 = vmatprep.subr.mxu0 %v2096_v1 }
 0x225   : > { %v1051_v37 = vpop.permute.xlu1 %1050 }
 0x226   : > { %v885_v36 = vpop.permute.xlu0 %884 }
 0x227   : > { %1673 = vmatmul.mubr.msk.f32.vlgmr.msra.gmra.mrb[4].mxu0 %vm723_vm2, %v885_v36 }
 0x228   : > { %1681 = vmatpush3.xpose.msk.msra.mxu0 %vm723_vm2, %v1053_v35  ;;  %1682 = vmatprep.mubr.msk.f32.mxu0 %vm2095_vm0, %v2096_v1 }
 0x229   : > { %1690 = vmatprep.subr.mxu0 %v2096_v1  ;;  %v1216_v39 = vpop.permute.xlu1 %1215 }
 0x22a   : > { %v1218_v38 = vpop.permute.xlu0 %1217 }
 0x22b   : > { %1683 = vmatmul.mubr.msk.f32.vlgmr.msra.gmra.mrb[6].mxu0 %vm723_vm2, %v1051_v37 }
 0x22c   : > { %1691 = vmatpush3.xpose.msk.msra.mxu0 %vm723_vm2, %v1218_v38  ;;  %1692 = vmatprep.mubr.msk.f32.mxu0 %vm2095_vm0, %v2096_v1 }
 0x22f   : > { %1693 = vmatmul.mubr.msk.f32.vlgmr.msra.gmra.mrb[8].mxu0 %vm723_vm2, %v1216_v39 }
 0x286   : > { %v796_v45 = vpop.f32.mrb[2].mxu1 }
 0x287   : > { %v1664_v46 = vpop.f32.mrb[3].mxu1  ;;  %v800_v47 = vsel %vm723_vm2, %v796_v45, -inf }
 0x288   : > { %801 = vmax.xlane.f32.xlu0 %v800_v47 }
 0x2fa   : > { %v958_v48 = vpop.f32.mrb[4].mxu0 }
 0x2fb   : > { %v1674_v49 = vpop.f32.mrb[5].mxu0  ;;  %v962_v50 = vsel %vm723_vm2, %v958_v48, -inf }
 0x2fc   : > { %963 = vmax.xlane.f32.xlu1 %v962_v50 }
 0x2fe   : > { %v1124_v51 = vpop.f32.mrb[6].mxu0 }
 0x2ff   : > { %v1684_v52 = vpop.f32.mrb[7].mxu0  ;;  %v1128_v53 = vsel %vm723_vm2, %v1124_v51, -inf }
 0x300   : > { %1129 = vmax.xlane.f32.xlu0 %v1128_v53 }
 0x302   : > { %v1289_v54 = vpop.f32.mrb[8].mxu0 }
 0x303   : > { %v1694_v55 = vpop.f32.mrb[9].mxu0  ;;  %v1293_v56 = vsel %vm723_vm2, %v1289_v54, -inf }
 0x304   : > { %1294 = vmax.xlane.f32.xlu0 %v1293_v56 }
 0x30d   : > { %974 = vrot.lane.b32.xlu1 %v721_v44, %s2098_s28 }
 0x315   : > { %v802_v57 = vpop.xlane.xlu0 %801 }
 0x316   : > { %v803_v58 = vsub.f32 %v796_v45, %v802_v57 }
 0x318   : > { %v804_v59 = vmul.f32 1.442695, %v803_v58 }
 0x31a   : > { %1816 = vpow2.f32 %v804_v59 }
 0x324   : > { %v1817_v60 = vpop.eup %1816 }
 0x325   : > { %v806_v61 = vsel %vm723_vm2, %v1817_v60, 0.0 }
 0x331   : > { %807 = vadd.xlane.f32.xlu1 %v806_v61 }
 0x389   : > { %v964_v62 = vpop.xlane.xlu1 %963 }
 0x38a   : > { %v965_v63 = vsub.f32 %v958_v48, %v964_v62 }
 0x38c   : > { %v966_v0 = vmul.f32 1.442695, %v965_v63 }
 0x38d   : > { %v1130_v2 = vpop.xlane.xlu0 %1129  ;;  %v975_v14 = vpop.permute.xlu1 %974 }
 0x38e   : > { %1818 = vpow2.f32 %v966_v0  ;;  %v1131_v3 = vsub.f32 %v1124_v51, %v1130_v2 }
 0x390   : > { %v1132_v4 = vmul.f32 1.442695, %v1131_v3 }
 0x391   : > { %v1295_v5 = vpop.xlane.xlu0 %1294 }
 0x392   : > { %1820 = vpow2.f32 %v1132_v4  ;;  %v1296_v6 = vsub.f32 %v1289_v54, %v1295_v5 }
 0x394   : > { %v1297_v7 = vmul.f32 1.442695, %v1296_v6 }
 0x396   : > { %1822 = vpow2.f32 %v1297_v7 }
 0x398   : > { %v1819_v8 = vpop.eup %1818 }
 0x399   : > { %v968_v9 = vsel %vm723_vm2, %v1819_v8, 0.0 }
 0x39a   : > { %969 = vadd.xlane.f32.xlu0 %v968_v9 }
 0x39c   : > { %v1821_v10 = vpop.eup %1820 }
 0x39d   : > { %v1134_v11 = vsel %vm723_vm2, %v1821_v10, 0.0 }
 0x39e   : > { %1135 = vadd.xlane.f32.xlu1 %v1134_v11 }
 0x3a0   : > { %v1823_v12 = vpop.eup %1822 }
 0x3a1   : > { %v1299_v13 = vsel %vm723_vm2, %v1823_v12, 0.0 }
 0x3a2   : > { %1300 = vadd.xlane.f32.xlu0 %v1299_v13 }
 0x3af   : > { %1304 = vrot.lane.b32.xlu1 %v721_v44, %s2099_s8 }
 0x3b8   : > { %1139 = vrot.lane.b32.xlu0 %v721_v44, %s2097_s9  ;;  %s2012_s9 = scalar_lea.vmem %s2011_s26, 256 }
 0x3b9   : > { %p2014_p7 = scmp.lt.s32.totalorder %s2012_s9, %s2006_s21 }
 0x3bb   : > { %p2015_p3 = por %p2014_p7, %p2013_p13 }
 0x3bd   : > { %p2016_p5 = pnand %p2015_p3, %p2009_p9 }
 0x3be   : > { %v808_v15 = vpop.xlane.xlu1 %807 }
 0x3bf   : > { %1824 = vrcp.f32 %v808_v15 }
 0x3c9   : > { %v1825_v16 = vpop.eup %1824 }
 0x3ca   : > { %v810_v17 = vmul.f32 %v1825_v16, %v1817_v60 }
 0x3cc   : > { %1668 = vmatmul.mubr.msk.f32.vlgmr.msra.gmra.mrb[4].mxu1 %vm723_vm2, %v810_v17 }
 0x3cd   : > { %1676 = vmatpush3.msra.mxu1 %v975_v14  ;;  %1677 = vmatprep.mubr.msk.f32.mxu1 %vm2095_vm0, %v2096_v1 }
 0x3ce   : > { %1685 = vmatprep.subr.mxu1 %v2096_v1 }
 0x427   : > { %v970_v18 = vpop.xlane.xlu0 %969 }
 0x428   : > { %1826 = vrcp.f32 %v970_v18 }
 0x42b   : > { %v1136_v19 = vpop.xlane.xlu1 %1135 }
 0x42c   : > { %1828 = vrcp.f32 %v1136_v19 }
 0x42f   : > { %v1301_v20 = vpop.xlane.xlu0 %1300  ;;  %v1305_v26 = vpop.permute.xlu1 %1304 }
 0x430   : > { %1830 = vrcp.f32 %v1301_v20 }
 0x432   : > { %v1827_v21 = vpop.eup %1826 }
 0x433   : > { %v972_v22 = vmul.f32 %v1827_v21, %v1819_v8  ;;  %v1140_v23 = vpop.permute.xlu0 %1139 }
 0x435   : > { %1678 = vmatmul.mubr.msk.f32.vlgmr.msra.gmra.mrb[6].mxu1 %vm723_vm2, %v972_v22 }
 0x436   : > { %v1829_v24 = vpop.eup %1828  ;;  %1686 = vmatpush3.msra.mxu1 %v1140_v23  ;;  %1687 = vmatprep.mubr.msk.f32.mxu1 %vm2095_vm0, %v2096_v1 }
 0x437   : > { %v1138_v25 = vmul.f32 %v1829_v24, %v1821_v10  ;;  %1695 = vmatprep.subr.mxu1 %v2096_v1 }
 0x439   : > { %1688 = vmatmul.mubr.msk.f32.vlgmr.msra.gmra.mrb[8].mxu1 %vm723_vm2, %v1138_v25 }
 0x43a   : > { %v1831_v27 = vpop.eup %1830  ;;  %1696 = vmatpush3.msra.mxu1 %v1305_v26  ;;  %1697 = vmatprep.mubr.msk.f32.mxu1 %vm2095_vm0, %v2096_v1 }
 0x43b   : > { %v1303_v28 = vmul.f32 %v1831_v27, %v1823_v12 }
 0x43d   : > { %1698 = vmatmul.mubr.msk.f32.vlgmr.msra.gmra.mrb[10].mxu1 %vm723_vm2, %v1303_v28 }
 0x49f   : > { %v880_v29 = vpop.f32.mrb[4].mxu1 }
 0x4a0   : > { %v1669_v30 = vpop.f32.mrb[5].mxu1 }
 0x508   : > { %v1046_v31 = vpop.f32.mrb[6].mxu1 }
 0x509   : > { %1381 = vrot.lane.b32.xlu1 %v1046_v31, %s2100_s16  ;;  %v1679_v32 = vpop.f32.mrb[7].mxu1 }
 0x50c   : > { %v1211_v33 = vpop.f32.mrb[8].mxu1 }
 0x50d   : > { %1385 = vrot.lane.b32.xlu0 %v1211_v33, %s2101_s25  ;;  %v1689_v34 = vpop.f32.mrb[9].mxu1 }
 0x510   : > { %v1376_v35 = vpop.f32.mrb[10].mxu1 }
 0x511   : > { %1389 = vrot.lane.b32.xlu1 %v1376_v35, %s2102_s23  ;;  %v1699_v1 = vpop.f32.mrb[11].mxu1 }
 0x57b   : > { %v1382_v36 = vpop.permute.xlu1 %1381 }
 0x57c   : > { %v1392_v38 = vsel %vm723_vm2, %v880_v29, %v1382_v36 }
 0x57f   : > { %v1386_v37 = vpop.permute.xlu0 %1385 }
 0x580   : > { %v1394_v39 = vsel %vm1393_vm3, %v1392_v38, %v1386_v37 }
 0x583   : > { %v1390_v40 = vpop.permute.xlu1 %1389 }
 0x584   : > { %v1396_v41 = vsel %vm1395_vm4, %v1394_v39, %v1390_v40 }
 0x585   : > { %1397 = vst.msk [vmem:[%s462_s20] sm:$0xff] %vm475_vm1, %v1396_v41 }
 0x586   : > { %2019 = shalt.err (!%p2016_p5)
}
 0x587   : > { %s2020_s14 = scalar_lea.hbm %s2523_s27, 128  ;;  %s2024_s12 = scalar_lea.hbm %s2641_s15, 256 }
 0x588   : > { %p2021_p2 = scmp.ne.s32.totalorder %s2523_s27, %s2020_s14  ;;  %p2025_p12 = scmp.lt.u32.totalorder %s2523_s27, %s2641_s15 }
 0x589   : > { %p2026_p1 = scmp.lt.u32.totalorder %s2024_s12, %s2020_s14  ;;  %p2028_p10 = scmp.lt.u32.totalorder %s2020_s14, %s2523_s27 }
 0x58a   : > { %p2022_p8 = pnand %p2021_p2, %p2642_p0 }
 0x58b   : > { %p2027_p6 = por %p2026_p1, %p2025_p12 }
 0x58c   : > { %p2023_p11 = pneg %p2022_p8 }
 0x58d   : > { %p2029_p4 = por %p2028_p10, %p2027_p6 }
 0x58f   : > { %p2030_p9 = pnand %p2029_p4, %p2023_p11 }
 0x591   : > { %2033 = shalt.err (!%p2030_p9)
}
 0x592   : > { %1736 = dma.vmem_to_hbm [thread:$0]  (%p2642_p0), %s2525_s17, 128, %s2523_s27, %s1399_s13  }
 0x593 PF: > { %s2643_s16 = sld [smem:[#allocation19_spill]]  ;;  %s2644_s25 = sld [smem:[#allocation21_spill]] }
 0x594   : > { %s2645_s23 = sld [smem:[#allocation20_spill]] }
 0x599   : > { %s1424_s3 = sand.u32 1, %s2643_s16   ;;  %p2646_p13 = scmp.ne.s32.totalorder %s2644_s25, 0 }
 0x59a   : > { %p2647_p7 = scmp.ge.s32.totalorder %s2645_s23, 2  ;;  %s1425_s20 = scalar_lea.sflag [#allocation4], %s1424_s3 }
 0x59c   : > { %p1759_p3 = pnand %p2647_p7, %p2646_p13 }
 0x59e   : > { %2067 = dma.done.wait (!%p1759_p3), %s1425_s20, 128  }
 0x59f   : > { %2069 = vsyncadd (!%p1759_p3), %s1425_s20, 4294967168  ;;  %s2648_s12 = sld [smem:[#allocation22_spill]]  ;;  %s2649_s24 = sld [smem:[#allocation23_spill]] }
 0x5a0   : > { %s2650_s30 = smov %s2076_s10  ;;  %s2651_s10 = smov %s2080_s11 }
 0x5a5   : > { %p27_p5 = scmp.ge.s32.totalorder %s2648_s12, 4   ;;  %s2652_s11 = smov %s2649_s24 }
 0x5a7   :  { %29 = sbr.rel (!%p27_p5) target bundleno = 14 (0xe), region = 137 }
 0x5ae   :  { %1430 = vsyncpa [#allocation3], 1 }
 0x5af   :  { %1432 = vsyncpa [#allocation3 + $0x1], 1 }
 0x5b0   :  { %1433 = vsyncpa [#allocation6], 1 }
 0x5b1   :  { %1435 = vsyncpa [#allocation6 + $0x1], 1 }
 0x5b2   :  { %1436 = vsyncpa [#allocation9], 1 }
 0x5b3   :  { %1437 = vsyncpa [#allocation12], 1 }
 0x5b4   :  { %1438 = vsyncpa [#allocation4], 1 }
 0x5b5   :  { %1440 = vsyncpa [#allocation4 + $0x1], 1 }

</bundles_post_ra>
